<compile_context>
chip_gen: v7x
topology: tpu7x:2x2x1
jax: 0.10.0
libtpu: 0.0.40
codegen_flags: <defaults>
</compile_context>

<pallas_src>
import functools

import jax
import jax.numpy as jnp
from jax.experimental import pallas as pl
from jax.experimental.pallas import tpu as pltpu


# ---------------------------------------------------------------------------
# Helpers
# ---------------------------------------------------------------------------
def _round_up(x, m):
    return (x + m - 1) // m * m


def _sublane_multiple(dtype):
    return {4: 8, 2: 16, 1: 32}.get(jnp.dtype(dtype).itemsize, 8)


def _default_block_bytes():
    """~4 MiB blocks on 128-MiB-VMEM parts (v5e/v6e), ~2 MiB on 64-MiB parts (v7x)."""
    vmem = 64 << 20
    try:
        vmem = int(getattr(pltpu.get_tpu_info(), "vmem_capacity_bytes", vmem))
    except Exception:
        pass
    return (4 << 20) if vmem >= (96 << 20) else (2 << 20)


def _vmem_limit_bytes(n_io_blocks, io_block_bytes, n_f32_blocks, f32_block_bytes):
    est = n_io_blocks * io_block_bytes + n_f32_blocks * f32_block_bytes + (2 << 20)
    return int(min(max(32 << 20, est), 100 << 20))


# ---------------------------------------------------------------------------
# Kernels
# ---------------------------------------------------------------------------
def _lin_fused_kernel(x_ref, p_ref, o_ref, *, eps, hw, c_hw):
    # x_ref: (TB, C, HWp) in the I/O dtype.  Zero-padded lanes (>= hw) and
    # zero-padded samples contribute nothing to the sums, so divisors use the
    # REAL hw / c*hw.
    xf = x_ref[...].astype(jnp.float32)

    # One reduction sweep: per-(sample, channel) sum and sum of squares.
    s = jnp.sum(xf, axis=2, keepdims=True)            # (TB, C, 1)
    sq = jnp.sum(xf * xf, axis=2, keepdims=True)      # (TB, C, 1)
    del xf  # do not keep the promoted tile live across the output FMA pass

    # Instance-norm stats (per n, c over HW), unbiased variance.
    in_mean = s * jnp.float32(1.0 / hw)
    in_var = (sq - s * in_mean) * jnp.float32(1.0 / (hw - 1))
    in_rstd = jax.lax.rsqrt(in_var + jnp.float32(eps))

    # Layer-norm stats (per n over C*HW) from the same partials.
    ln_s = jnp.sum(s, axis=1, keepdims=True)           # (TB, 1, 1)
    ln_sq = jnp.sum(sq, axis=1, keepdims=True)         # (TB, 1, 1)
    ln_mean = ln_s * jnp.float32(1.0 / c_hw)
    ln_var = (ln_sq - ln_s * ln_mean) * jnp.float32(1.0 / (c_hw - 1))
    ln_rstd = jax.lax.rsqrt(ln_var + jnp.float32(eps))

    # Packed, resident params: row 0 = gamma*rho, row 1 = gamma*(1-rho), row 2 = beta.
    g_in = p_ref[0]     # (C, 1)
    g_ln = p_ref[1]     # (C, 1)
    beta = p_ref[2]     # (C, 1)

    a = g_in * in_rstd + g_ln * ln_rstd                                    # (TB, C, 1)
    b = beta - g_in * (in_mean * in_rstd) - g_ln * (ln_mean * ln_rstd)     # (TB, C, 1)

    # Re-read + cast (cheap VPU op on the VMEM-resident tile) instead of
    # holding the f32 copy live from the reduction pass.
    o_ref[...] = (a * x_ref[...].astype(jnp.float32) + b).astype(o_ref.dtype)


def _lin_stats_kernel(x_ref, s_ref, sq_ref):
    # grid = (n_blocks, hw_blocks); the HW axis is a reduction -> accumulate
    # into the resident (TBs, C, 1) output blocks.
    @pl.when(pl.program_id(1) == 0)
    def _():
        s_ref[...] = jnp.zeros_like(s_ref)
        sq_ref[...] = jnp.zeros_like(sq_ref)

    xf = x_ref[...].astype(jnp.float32)                # (TBs, C, HWT)
    s_ref[...] += jnp.sum(xf, axis=2, keepdims=True)
    sq_ref[...] += jnp.sum(xf * xf, axis=2, keepdims=True)


def _lin_apply_kernel(x_ref, a_ref, b_ref, o_ref):
    # Pure streaming pass: out = a * x + b with per-(n, c) coefficients.
    o_ref[...] = (a_ref[...] * x_ref[...].astype(jnp.float32)
                  + b_ref[...]).astype(o_ref.dtype)


# ---------------------------------------------------------------------------
# Wrapper
# ---------------------------------------------------------------------------
def lin_forward(x_nchw, rho, gamma, beta, eps=1e-5, *, block_bytes=None):
    """x_nchw: (N, C, H, W); rho/gamma/beta: (1, C, 1, 1). Returns (N, C, H, W)."""
    N, C, H, W = x_nchw.shape
    HW = H * W
    assert HW > 1 and C * HW > 1, "unbiased (ddof=1) variance needs > 1 element"

    dtype = x_nchw.dtype
    itemsize = jnp.dtype(dtype).itemsize
    c_pad = _round_up(C, _sublane_multiple(dtype))   # VMEM sublane footprint of C
    if block_bytes is None:
        block_bytes = _default_block_bytes()

    # Sample-independent parameter folding (done once in the wrapper).
    rho_f = rho.reshape(C, 1).astype(jnp.float32)
    gamma_f = gamma.reshape(C, 1).astype(jnp.float32)
    beta_f = beta.reshape(C, 1).astype(jnp.float32)
    g_in = gamma_f * rho_f
    g_ln = gamma_f * (1.0 - rho_f)

    x = x_nchw.reshape(N, C, HW)
    hwp = _round_up(HW, 128)                         # lane-dense last dim
    per_sample_vmem = c_pad * hwp * itemsize
    eps = float(eps)

    if per_sample_vmem <= block_bytes:
        # ----------------- single fused pass -----------------
        tb_bytes = max(1, block_bytes // per_sample_vmem)
        tb_grid = max(1, -(-N // 4))                      # >= 4 grid steps when N allows
        tb_floor = max(1, (1 << 20) // per_sample_vmem)   # aim for >= ~1 MiB blocks
        tb = max(1, min(tb_bytes, max(tb_grid, tb_floor), N))
        n_pad = _round_up(N, tb)

        if n_pad != N or hwp != HW:
            x = jnp.pad(x, ((0, n_pad - N), (0, 0), (0, hwp - HW)))

        params = jnp.stack([g_in, g_ln, beta_f], axis=0)  # (3, C, 1), resident

        io_blk = tb * c_pad * hwp * itemsize
        f32_blk = tb * c_pad * hwp * 4
        kernel = functools.partial(_lin_fused_kernel, eps=eps, hw=HW, c_hw=C * HW)

        out = pl.pallas_call(
            kernel,
            out_shape=jax.ShapeDtypeStruct((n_pad, C, hwp), dtype),
            grid_spec=pltpu.PrefetchScalarGridSpec(
                num_scalar_prefetch=0,
                grid=(n_pad // tb,),
                in_specs=[
                    pl.BlockSpec((tb, C, hwp), lambda n: (n, 0, 0)),
                    pl.BlockSpec((3, C, 1), lambda n: (0, 0, 0)),
                ],
                out_specs=pl.BlockSpec((tb, C, hwp), lambda n: (n, 0, 0)),
            ),
            compiler_params=pltpu.CompilerParams(
                dimension_semantics=("parallel",),
                vmem_limit_bytes=_vmem_limit_bytes(4, io_blk, 3, f32_blk),
            ),
        )(x, params)
    else:
        # ------- large per-sample slab: split HW (stats sweep, then apply) -------
        tbs = 1
        hwt = max(128, (block_bytes // (tbs * c_pad * itemsize)) // 128 * 128)
        hwt = min(hwt, _round_up(HW, 128))
        hwp = _round_up(HW, hwt)
        n_pad = _round_up(N, tbs)
        if n_pad != N or hwp != HW:
            x = jnp.pad(x, ((0, n_pad - N), (0, 0), (0, hwp - HW)))
        nb, hb = n_pad // tbs, hwp // hwt

        io_blk = tbs * c_pad * hwt * itemsize
        f32_blk = tbs * c_pad * hwt * 4

        s, sq = pl.pallas_call(
            _lin_stats_kernel,
            out_shape=(jax.ShapeDtypeStruct((n_pad, C, 1), jnp.float32),
                       jax.ShapeDtypeStruct((n_pad, C, 1), jnp.float32)),
            grid_spec=pltpu.PrefetchScalarGridSpec(
                num_scalar_prefetch=0,
                grid=(nb, hb),
                in_specs=[pl.BlockSpec((tbs, C, hwt), lambda n, h: (n, 0, h))],
                out_specs=[pl.BlockSpec((tbs, C, 1), lambda n, h: (n, 0, 0)),
                           pl.BlockSpec((tbs, C, 1), lambda n, h: (n, 0, 0))],
            ),
            compiler_params=pltpu.CompilerParams(
                dimension_semantics=("parallel", "arbitrary"),
                vmem_limit_bytes=_vmem_limit_bytes(2, io_blk, 2, f32_blk),
            ),
        )(x)

        # Tiny (n_pad, C, 1) coefficient math in plain JAX.
        in_mean = s * (1.0 / HW)
        in_var = (sq - s * in_mean) * (1.0 / (HW - 1))
        in_rstd = jax.lax.rsqrt(in_var + eps)
        ln_s = jnp.sum(s, axis=1, keepdims=True)
        ln_sq = jnp.sum(sq, axis=1, keepdims=True)
        ln_mean = ln_s * (1.0 / (C * HW))
        ln_var = (ln_sq - ln_s * ln_mean) * (1.0 / (C * HW - 1))
        ln_rstd = jax.lax.rsqrt(ln_var + eps)
        a = g_in[None] * in_rstd + g_ln[None] * ln_rstd
        b = beta_f[None] - g_in[None] * (in_mean * in_rstd) - g_ln[None] * (ln_mean * ln_rstd)

        out = pl.pallas_call(
            _lin_apply_kernel,
            out_shape=jax.ShapeDtypeStruct((n_pad, C, hwp), dtype),
            grid_spec=pltpu.PrefetchScalarGridSpec(
                num_scalar_prefetch=0,
                grid=(nb, hb),
                in_specs=[pl.BlockSpec((tbs, C, hwt), lambda n, h: (n, 0, h)),
                          pl.BlockSpec((tbs, C, 1), lambda n, h: (n, 0, 0)),
                          pl.BlockSpec((tbs, C, 1), lambda n, h: (n, 0, 0))],
                out_specs=pl.BlockSpec((tbs, C, hwt), lambda n, h: (n, 0, h)),
            ),
            compiler_params=pltpu.CompilerParams(
                dimension_semantics=("parallel", "parallel"),
                vmem_limit_bytes=_vmem_limit_bytes(4, io_blk, 2, f32_blk),
            ),
        )(x, a.astype(jnp.float32), b.astype(jnp.float32))

    if out.shape[0] != N or out.shape[2] != HW:
        out = out[:N, :, :HW]
    return out.reshape(N, C, H, W)


# ---------------------------------------------------------------------------
# Pure-JAX reference (matches the PyTorch forward; torch.var is unbiased)
# ---------------------------------------------------------------------------
def lin_reference(x, rho, gamma, beta, eps=1e-5):
    N, C, H, W = x.shape
    xf = x.astype(jnp.float32)
    xin = xf.reshape(N, C, H * W)
    in_mean = jnp.mean(xin, axis=2)[:, :, None, None]
    in_var = jnp.var(xin, axis=2, ddof=1)[:, :, None, None]
    x_in = (xf - in_mean) / jnp.sqrt(in_var + eps)
    xln = xf.reshape(N, -1)
    ln_mean = jnp.mean(xln, axis=1)[:, None, None, None]
    ln_var = jnp.var(xln, axis=1, ddof=1)[:, None, None, None]
    x_ln = (xf - ln_mean) / jnp.sqrt(ln_var + eps)
    out = rho * x_in + (1.0 - rho) * x_ln
    return gamma * out + beta


if __name__ == "__main__":
    key = jax.random.PRNGKey(0)
    k_x, k_x2, k_rho, k_gamma, k_beta = jax.random.split(key, 5)

    N, C, H, W = 2, 4, 16, 16
    x = jax.random.normal(k_x, (N, C, H, W), dtype=jnp.float32)

    # Module default init: rho=0, gamma=1, beta=0.
    rho0 = jnp.zeros((1, C, 1, 1), jnp.float32)
    gamma0 = jnp.ones((1, C, 1, 1), jnp.float32)
    beta0 = jnp.zeros((1, C, 1, 1), jnp.float32)
    # Non-trivial params exercising the IN/LN mixing path.
    rho1 = jax.random.uniform(k_rho, (1, C, 1, 1), dtype=jnp.float32)
    gamma1 = 1.0 + 0.1 * jax.random.normal(k_gamma, (1, C, 1, 1), dtype=jnp.float32)
    beta1 = 0.1 * jax.random.normal(k_beta, (1, C, 1, 1), dtype=jnp.float32)

    def check(out, ref, name):
        assert out.shape == ref.shape, name
        assert jnp.allclose(out, ref, atol=1e-4, rtol=1e-4), "mismatch (%s)" % name

    # 1) Default init on the fused path.
    out0 = jax.block_until_ready(lin_forward(x, rho0, gamma0, beta0))
    check(out0, lin_reference(x, rho0, gamma0, beta0), "default init")

    # 2) Mixed IN/LN params on the fused path.
    out1 = jax.block_until_ready(lin_forward(x, rho1, gamma1, beta1))
    check(out1, lin_reference(x, rho1, gamma1, beta1), "mixed init")

    # 3) Lane-unaligned spatial size (HW=49 -> padded to 128) and odd batch.
    x2 = jax.random.normal(k_x2, (3, C, 7, 7), dtype=jnp.float32)
    out2 = jax.block_until_ready(lin_forward(x2, rho1, gamma1, beta1))
    check(out2, lin_reference(x2, rho1, gamma1, beta1), "unaligned HW")

    # 4) Force the large-slab split path (stats sweep + apply) via a tiny budget.
    out3 = jax.block_until_ready(lin_forward(x, rho1, gamma1, beta1, block_bytes=4096))
    check(out3, lin_reference(x, rho1, gamma1, beta1), "split path")

    print("KERNEL_OK")
</pallas_src>

<mosaic_0001>
module attributes {stable_mosaic.version = 11 : i64} {
  func.func @_lin_fused_kernel(%arg0: i32, %arg1: memref<2x4x256xf32, #tpu.memory_space<vmem>>, %arg2: memref<3x4x1xf32, #tpu.memory_space<vmem>>, %arg3: memref<2x4x256xf32, #tpu.memory_space<vmem>>) attributes {dimension_semantics = [#tpu.dimension_semantics<parallel>], iteration_bounds = array<i64: 1>, scalar_prefetch = 0 : i64, scratch_operands = 0 : i64, tpu.core_type = #tpu.core_type<tc>, window_params = [{transform_indices = @transform_0, window_bounds = array<i64: 2, 4, 256>}, {pipeline_mode = #tpu.pipeline_mode<synchronous>, transform_indices = @transform_1, window_bounds = array<i64: 3, 4, 1>}, {transform_indices = @transform_2, window_bounds = array<i64: 2, 4, 256>}]} {
    %c0 = arith.constant 0 : index
    %c0_0 = arith.constant 0 : index
    %c0_1 = arith.constant 0 : index
    %0 = vector.load %arg1[%c0, %c0_0, %c0_1] : memref<2x4x256xf32, #tpu.memory_space<vmem>>, vector<2x4x256xf32>
    %cst = arith.constant dense<0.000000e+00> : vector<2x4xf32>
    %1 = vector.multi_reduction <add>, %0, %cst [2] : vector<2x4x256xf32> to vector<2x4xf32>
    %2 = vector.shape_cast %1 : vector<2x4xf32> to vector<2x4x1xf32>
    %3 = arith.mulf %0, %0 : vector<2x4x256xf32>
    %cst_2 = arith.constant dense<0.000000e+00> : vector<2x4xf32>
    %4 = vector.multi_reduction <add>, %3, %cst_2 [2] : vector<2x4x256xf32> to vector<2x4xf32>
    %5 = vector.shape_cast %4 : vector<2x4xf32> to vector<2x4x1xf32>
    %cst_3 = arith.constant 3.906250e-03 : f32
    %6 = vector.broadcast %cst_3 : f32 to vector<2x4x1xf32>
    %7 = arith.mulf %2, %6 : vector<2x4x1xf32>
    %8 = arith.mulf %2, %7 : vector<2x4x1xf32>
    %9 = arith.subf %5, %8 : vector<2x4x1xf32>
    %cst_4 = arith.constant 0.00392156886 : f32
    %10 = vector.broadcast %cst_4 : f32 to vector<2x4x1xf32>
    %11 = arith.mulf %9, %10 : vector<2x4x1xf32>
    %cst_5 = arith.constant 9.99999974E-6 : f32
    %12 = vector.broadcast %cst_5 : f32 to vector<2x4x1xf32>
    %13 = arith.addf %11, %12 : vector<2x4x1xf32>
    %14 = math.rsqrt %13 : vector<2x4x1xf32>
    %cst_6 = arith.constant dense<0.000000e+00> : vector<2x1xf32>
    %15 = vector.multi_reduction <add>, %2, %cst_6 [1] : vector<2x4x1xf32> to vector<2x1xf32>
    %16 = vector.shape_cast %15 : vector<2x1xf32> to vector<2x1x1xf32>
    %cst_7 = arith.constant dense<0.000000e+00> : vector<2x1xf32>
    %17 = vector.multi_reduction <add>, %5, %cst_7 [1] : vector<2x4x1xf32> to vector<2x1xf32>
    %18 = vector.shape_cast %17 : vector<2x1xf32> to vector<2x1x1xf32>
    %cst_8 = arith.constant 9.765625E-4 : f32
    %19 = vector.broadcast %cst_8 : f32 to vector<2x1x1xf32>
    %20 = arith.mulf %16, %19 : vector<2x1x1xf32>
    %21 = arith.mulf %16, %20 : vector<2x1x1xf32>
    %22 = arith.subf %18, %21 : vector<2x1x1xf32>
    %cst_9 = arith.constant 9.77517105E-4 : f32
    %23 = vector.broadcast %cst_9 : f32 to vector<2x1x1xf32>
    %24 = arith.mulf %22, %23 : vector<2x1x1xf32>
    %cst_10 = arith.constant 9.99999974E-6 : f32
    %25 = vector.broadcast %cst_10 : f32 to vector<2x1x1xf32>
    %26 = arith.addf %24, %25 : vector<2x1x1xf32>
    %27 = math.rsqrt %26 : vector<2x1x1xf32>
    %c0_11 = arith.constant 0 : index
    %c0_12 = arith.constant 0 : index
    %c0_13 = arith.constant 0 : index
    %28 = vector.load %arg2[%c0_11, %c0_12, %c0_13] : memref<3x4x1xf32, #tpu.memory_space<vmem>>, vector<1x4x1xf32>
    %29 = vector.shape_cast %28 : vector<1x4x1xf32> to vector<4x1xf32>
    %c1 = arith.constant 1 : index
    %c0_14 = arith.constant 0 : index
    %c0_15 = arith.constant 0 : index
    %30 = vector.load %arg2[%c1, %c0_14, %c0_15] : memref<3x4x1xf32, #tpu.memory_space<vmem>>, vector<1x4x1xf32>
    %31 = vector.shape_cast %30 : vector<1x4x1xf32> to vector<4x1xf32>
    %c2 = arith.constant 2 : index
    %c0_16 = arith.constant 0 : index
    %c0_17 = arith.constant 0 : index
    %32 = vector.load %arg2[%c2, %c0_16, %c0_17] : memref<3x4x1xf32, #tpu.memory_space<vmem>>, vector<1x4x1xf32>
    %33 = vector.shape_cast %32 : vector<1x4x1xf32> to vector<4x1xf32>
    %34 = vector.shape_cast %29 : vector<4x1xf32> to vector<1x4x1xf32>
    %35 = vector.broadcast %34 : vector<1x4x1xf32> to vector<2x4x1xf32>
    %36 = arith.mulf %35, %14 : vector<2x4x1xf32>
    %37 = vector.shape_cast %31 : vector<4x1xf32> to vector<1x4x1xf32>
    %38 = vector.broadcast %37 : vector<1x4x1xf32> to vector<2x4x1xf32>
    %39 = vector.broadcast %27 : vector<2x1x1xf32> to vector<2x4x1xf32>
    %40 = arith.mulf %38, %39 : vector<2x4x1xf32>
    %41 = arith.addf %36, %40 : vector<2x4x1xf32>
    %42 = arith.mulf %7, %14 : vector<2x4x1xf32>
    %43 = vector.shape_cast %29 : vector<4x1xf32> to vector<1x4x1xf32>
    %44 = vector.broadcast %43 : vector<1x4x1xf32> to vector<2x4x1xf32>
    %45 = arith.mulf %44, %42 : vector<2x4x1xf32>
    %46 = vector.shape_cast %33 : vector<4x1xf32> to vector<1x4x1xf32>
    %47 = vector.broadcast %46 : vector<1x4x1xf32> to vector<2x4x1xf32>
    %48 = arith.subf %47, %45 : vector<2x4x1xf32>
    %49 = arith.mulf %20, %27 : vector<2x1x1xf32>
    %50 = vector.shape_cast %31 : vector<4x1xf32> to vector<1x4x1xf32>
    %51 = vector.broadcast %50 : vector<1x4x1xf32> to vector<2x4x1xf32>
    %52 = vector.broadcast %49 : vector<2x1x1xf32> to vector<2x4x1xf32>
    %53 = arith.mulf %51, %52 : vector<2x4x1xf32>
    %54 = arith.subf %48, %53 : vector<2x4x1xf32>
    %c0_18 = arith.constant 0 : index
    %c0_19 = arith.constant 0 : index
    %c0_20 = arith.constant 0 : index
    %55 = vector.load %arg1[%c0_18, %c0_19, %c0_20] : memref<2x4x256xf32, #tpu.memory_space<vmem>>, vector<2x4x256xf32>
    %56 = vector.broadcast %41 : vector<2x4x1xf32> to vector<2x4x256xf32>
    %57 = arith.mulf %56, %55 : vector<2x4x256xf32>
    %58 = vector.broadcast %54 : vector<2x4x1xf32> to vector<2x4x256xf32>
    %59 = arith.addf %57, %58 : vector<2x4x256xf32>
    %c0_21 = arith.constant 0 : index
    %c0_22 = arith.constant 0 : index
    %c0_23 = arith.constant 0 : index
    %60 = vector.load %arg3[%c0_21, %c0_22, %c0_23] : memref<2x4x256xf32, #tpu.memory_space<vmem>>, vector<2x4x256xf32>
    tpu.vector_store %arg3[%c0_21, %c0_22, %c0_23], %59 {strides = array<i32>} : memref<2x4x256xf32, #tpu.memory_space<vmem>>, vector<2x4x256xf32>,
    return
  }
  func.func @transform_0(%arg0: i32) -> (i32, i32, i32) {
    %c0_i32 = arith.constant 0 : i32
    %c0_i32_0 = arith.constant 0 : i32
    %c0_i32_1 = arith.constant 0 : i32
    return %arg0, %c0_i32, %c0_i32_0 : i32, i32, i32
  }
  func.func @transform_1(%arg0: i32) -> (i32, i32, i32) {
    %c0_i32 = arith.constant 0 : i32
    %c0_i32_0 = arith.constant 0 : i32
    %c0_i32_1 = arith.constant 0 : i32
    %c0_i32_2 = arith.constant 0 : i32
    return %c0_i32, %c0_i32_0, %c0_i32_1 : i32, i32, i32
  }
  func.func @transform_2(%arg0: i32) -> (i32, i32, i32) {
    %c0_i32 = arith.constant 0 : i32
    %c0_i32_0 = arith.constant 0 : i32
    %c0_i32_1 = arith.constant 0 : i32
    return %arg0, %c0_i32, %c0_i32_0 : i32, i32, i32
  }
}

</mosaic_0001>

<bundles_post_ra>
// kernel: tpu_custom_call.1
= control target key start
LH: loop header
LB: loop body
LE: loop exit
PB: predicated region body
PF: predicated region fallthrough
CT: control target
= control target key end

     0   :  { %7 = vsyncpa [#allocation3], 0  ;;  %s355_s0 = inlined_call_operand.hbm [shape: f32[2,4,256], index: 0, kind: input, shape index: {}]   ;;  %s356_s1 = inlined_call_operand.vmem [shape: f32[3,4,1], index: 1, kind: input, shape index: {}]   ;;  %s357_s2 = inlined_call_operand.hbm [shape: f32[2,4,256], index: 2, kind: output, shape index: {}]  }
   0x1   :  { %8 = vsyncpa [#allocation4], 0  ;;  %s260_s9 = smov [#allocation2]   ;;  %s212_s13 = scalar_lea.hbm %s355_s0, 256 }
   0x2   :  { %s14_s10 = sshll.u32 %s260_s9, 4  ;;  %p213_p0 = scmp.ne.s32.totalorder %s355_s0, %s212_s13  ;;  %s15_s10 = int_to_ptr.vmem [resolvable:$true] %s14_s10 }
   0x3   :  { %p216_p1 = scmp.lt.u32.totalorder %s212_s13, %s355_s0 }
   0x5   :  { %p218_p2 = pnand %p216_p1, %p213_p0 }
   0x7   :  { %221 = shalt.err (!%p218_p2)
}
   0x8   :  { %s222_s18 = scalar_lea.vmem %s15_s10, 256  ;;  %p227_p4 = scmp.lt.s32.totalorder %s15_s10, %s15_s10 }
   0x9   :  { %p223_p3 = scmp.ne.s32.totalorder %s15_s10, %s222_s18  ;;  %p228_p5 = scmp.lt.s32.totalorder %s222_s18, %s222_s18 }
   0xb   :  { %p229_p6 = por %p228_p5, %p227_p4 }
   0xd   :  { %p230_p7 = pnand %p229_p6, %p223_p3 }
   0xf   :  { %233 = shalt.err (!%p230_p7)
}
  0x10   :  { %s261_s19 = smov 128   ;;  %s262_s20 = smov 8  }
  0x11   :  { %20 = dma.hbm_to_vmem [thread:$0]  %s355_s0, 256, %s15_s10, [#allocation3], %s261_s19, %s261_s19, %s262_s20  }
  0x12   :  { %256 = dma.done.wait [#allocation3], 256  }
  0x13   :  { %257 = vsyncadd [#allocation3], 4294967040  ;;  %vm34_vm0 = vcmask 1043456   ;;  %v295_v0 = vld [vmem:[#allocation2] sm:$0xff]  ;;  %v297_v1 = vld [vmem:[#allocation2 + $0x8] sm:$0xff]  ;;  %v263_v20 = vmov 0  }
  0x14   :  { %v301_v2 = vcombine.high %v295_v0, %v295_v0  ;;  %v35_v3 = vsel %vm34_vm0, %v295_v0, 0.0  ;;  %v45_v4 = vmul.f32 %v295_v0, %v295_v0  ;;  %v309_v5 = vcombine.high %v297_v1, %v297_v1  ;;  %200 = vset.pattern.permute.xlu0 %v263_v20  ;;  %201 = vset.pattern.permute.xlu1 %v263_v20 }
  0x15   :  { %v40_v6 = vsel %vm34_vm0, %v297_v1, 0.0  ;;  %v46_v7 = vmul.f32 %v297_v1, %v297_v1 }
  0x16   :  { %v36_v8 = vsel %vm34_vm0, %v301_v2, 0.0  ;;  %v49_v9 = vcombine.high %v45_v4, %v45_v4  ;;  %v53_v10 = vsel %vm34_vm0, %v45_v4, 0.0  ;;  %v41_v11 = vsel %vm34_vm0, %v309_v5, 0.0 }
  0x17   :  { %v37_v12 = vadd.f32 %v36_v8, %v35_v3  ;;  %v50_v13 = vcombine.high %v46_v7, %v46_v7  ;;  %v58_v15 = vsel %vm34_vm0, %v46_v7, 0.0  ;;  %v42_v17 = vadd.f32 %v41_v11, %v40_v6 }
  0x18   :  { %v54_v14 = vsel %vm34_vm0, %v49_v9, 0.0 }
  0x19   :  { %38 = vadd.xlane.f32.xlu0 %v37_v12  ;;  %v55_v16 = vadd.f32 %v54_v14, %v53_v10  ;;  %v59_v18 = vsel %vm34_vm0, %v50_v13, 0.0  ;;  %v115_v14 = vld [vmem:[%s356_s1] sm:$0xf] }
  0x1a   :  { %v60_v19 = vadd.f32 %v59_v18, %v58_v15  ;;  %v193_v15 = vld [vmem:[%s356_s1 + $0x4] sm:$0xf] }
  0x1b   :  { %56 = vadd.xlane.f32.xlu1 %v55_v16 }
  0x1d   :  { %43 = vadd.xlane.f32.xlu0 %v42_v17 }
  0x1f   :  { %61 = vadd.xlane.f32.xlu1 %v60_v19 }
  0xa6   :  { %v39_v21 = vpop.xlane.xlu0 %38 }
  0xa7   :  { %v63_v22 = vmul.f32 0.00390625, %v39_v21  ;;  %v75_v23 = vsel %vm34_vm0, %v39_v21, 0.0 }
  0xa8   :  { %v76_v24 = vrot.slane %v75_v23, 4  ;;  %v57_v25 = vpop.xlane.xlu1 %56 }
  0xa9   :  { %v89_v26 = vsel %vm34_vm0, %v57_v25, 0.0  ;;  %v65_v30 = vmul.f32 %v63_v22, %v39_v21 }
  0xaa   :  { %v77_v27 = vadd.f32 %v76_v24, %v75_v23  ;;  %v90_v28 = vrot.slane %v89_v26, 4  ;;  %v44_v29 = vpop.xlane.xlu0 %43 }
  0xab   :  { %v64_v31 = vmul.f32 0.00390625, %v44_v29  ;;  %v82_v32 = vsel %vm34_vm0, %v44_v29, 0.0  ;;  %v67_v42 = vsub.f32 %v57_v25, %v65_v30 }
  0xac   :  { %v78_v33 = vrot.slane %v77_v27, 2  ;;  %v91_v34 = vadd.f32 %v90_v28, %v89_v26  ;;  %v83_v35 = vrot.slane %v82_v32, 4  ;;  %v62_v36 = vpop.xlane.xlu1 %61 }
  0xad   :  { %v96_v37 = vsel %vm34_vm0, %v62_v36, 0.0  ;;  %v66_v43 = vmul.f32 %v64_v31, %v44_v29  ;;  %v69_v52 = vmul.f32 0.003921569, %v67_v42  ;;  %v194_v29 = vld [vmem:[%s356_s1 + $0x8] sm:$0xf]  ;;  %s264_s1 = smov [#allocation5]  }
  0xae   :  { %v79_v38 = vadd.f32 %v78_v33, %v77_v27  ;;  %v92_v39 = vrot.slane %v91_v34, 2  ;;  %v84_v40 = vadd.f32 %v83_v35, %v82_v32  ;;  %v97_v41 = vrot.slane %v96_v37, 4  ;;  %s181_s28 = sshll.u32 %s264_s1, 4  ;;  %s182_s28 = int_to_ptr.vmem [resolvable:$true] %s181_s28 }
  0xaf   :  { %v68_v55 = vsub.f32 %v62_v36, %v66_v43  ;;  %v71_v61 = vadd.f32 1e-05, %v69_v52  ;;  %s234_s29 = scalar_lea.vmem %s182_s28, 256  ;;  %p239_p9 = scmp.lt.s32.totalorder %s182_s28, %s182_s28 }
  0xb0   :  { %v80_v44 = vrot.slane %v79_v38, 1  ;;  %v93_v45 = vadd.f32 %v92_v39, %v91_v34  ;;  %v85_v46 = vrot.slane %v84_v40, 2  ;;  %v98_v47 = vadd.f32 %v97_v41, %v96_v37  ;;  %p235_p8 = scmp.ne.s32.totalorder %s182_s28, %s234_s29  ;;  %p240_p10 = scmp.lt.s32.totalorder %s234_s29, %s234_s29 }
  0xb1   :  { %v70_v3 = vmul.f32 0.003921569, %v68_v55  ;;  %204 = vrsqrt.f32 %v71_v61 }
  0xb2   :  { %v81_v48 = vadd.f32 %v80_v44, %v79_v38  ;;  %v94_v49 = vrot.slane %v93_v45, 1  ;;  %v86_v50 = vadd.f32 %v85_v46, %v84_v40  ;;  %v99_v51 = vrot.slane %v98_v47, 2  ;;  %p241_p11 = por %p240_p10, %p239_p9 }
  0xb3   :  { %v72_v9 = vadd.f32 1e-05, %v70_v3 }
  0xb4   :  { %v103_v53 = vmul.f32 0.0009765625, %v81_v48  ;;  %v87_v54 = vrot.slane %v86_v50, 1  ;;  %v100_v56 = vadd.f32 %v99_v51, %v98_v47  ;;  %v95_v58 = vadd.f32 %v94_v49, %v93_v45  ;;  %p242_p12 = pnand %p241_p11, %p235_p8 }
  0xb6   :  { %v105_v57 = vmul.f32 %v103_v53, %v81_v48  ;;  %v88_v59 = vadd.f32 %v87_v54, %v86_v50  ;;  %v101_v60 = vrot.slane %v100_v56, 1 }
  0xb8   :  { %v107_v62 = vsub.f32 %v95_v58, %v105_v57  ;;  %v104_v63 = vmul.f32 0.0009765625, %v88_v59  ;;  %v102_v7 = vadd.f32 %v101_v60, %v100_v56 }
  0xba   :  { %v109_v4 = vmul.f32 0.0009775171, %v107_v62  ;;  %v106_v6 = vmul.f32 %v104_v63, %v88_v59 }
  0xbb   :  { %v205_v13 = vpop.eup %204 }
  0xbc   :  { %v111_v8 = vadd.f32 1e-05, %v109_v4  ;;  %v108_v10 = vsub.f32 %v102_v7, %v106_v6  ;;  %v120_v17 = vmul.f32 %v205_v13, %v115_v14  ;;  %v126_v19 = vmul.f32 %v205_v13, %v63_v22 }
  0xbe   :  { %206 = vrsqrt.f32 %v111_v8  ;;  %v110_v11 = vmul.f32 0.0009775171, %v108_v10  ;;  %v128_v27 = vmul.f32 %v126_v19, %v115_v14 }
  0xbf   :  { %208 = vrsqrt.f32 %v72_v9 }
  0xc0   :  { %v112_v12 = vadd.f32 1e-05, %v110_v11  ;;  %v130_v34 = vsub.f32 %v194_v29, %v128_v27 }
  0xc2   :  { %210 = vrsqrt.f32 %v112_v12 }
  0xc8   :  { %v207_v16 = vpop.eup %206 }
  0xc9   :  { %v122_v18 = vmul.f32 %v207_v16, %v193_v15  ;;  %v209_v20 = vpop.eup %208  ;;  %v132_v23 = vmul.f32 %v207_v16, %v103_v53 }
  0xca   :  { %v121_v25 = vmul.f32 %v209_v20, %v115_v14  ;;  %v127_v28 = vmul.f32 %v209_v20, %v64_v31 }
  0xcb   :  { %v124_v21 = vadd.f32 %v122_v18, %v120_v17  ;;  %v134_v32 = vmul.f32 %v193_v15, %v132_v23 }
  0xcc   :  { %v211_v24 = vpop.eup %210  ;;  %v129_v35 = vmul.f32 %v127_v28, %v115_v14 }
  0xcd   :  { %140 = vperm.xlu0 %200, %v124_v21   ;;  %v123_v26 = vmul.f32 %v211_v24, %v193_v15  ;;  %v133_v33 = vmul.f32 %v211_v24, %v104_v63  ;;  %v136_v22 = vsub.f32 %v130_v34, %v134_v32 }
  0xce   :  { %v131_v37 = vsub.f32 %v194_v29, %v129_v35 }
  0xcf   :  { %v125_v30 = vadd.f32 %v123_v26, %v121_v25  ;;  %v135_v36 = vmul.f32 %v193_v15, %v133_v33 }
  0xd1   :  { %145 = vperm.xlu1 %201, %v125_v30   ;;  %v137_v38 = vsub.f32 %v131_v37, %v135_v36 }
  0xd5   :  { %154 = vperm.xlu1 %201, %v136_v22  }
  0xd9   :  { %159 = vperm.xlu1 %201, %v137_v38  }
 0x14c   :  { %v141_v39 = vpop.permute.xlu0 %140 }
 0x14d   :  { %v148_v31 = vmul.f32 %v141_v39, %v295_v0  ;;  %v149_v41 = vmul.f32 %v141_v39, %v301_v2 }
 0x150   :  { %v146_v40 = vpop.permute.xlu1 %145 }
 0x151   :  { %v150_v45 = vmul.f32 %v146_v40, %v297_v1  ;;  %v151_v46 = vmul.f32 %v146_v40, %v309_v5 }
 0x154   :  { %v155_v42 = vpop.permute.xlu1 %154 }
 0x155   :  { %v162_v43 = vadd.f32 %v155_v42, %v148_v31  ;;  %v163_v44 = vadd.f32 %v155_v42, %v149_v41 }
 0x157   :  { %v170_v47 = vcombine.low %v162_v43, %v163_v44 }
 0x158   :  { %v160_v48 = vpop.permute.xlu1 %159 }
 0x159   :  { %174 = vst [vmem:[#allocation5] sm:$0xff] %v170_v47  ;;  %v164_v49 = vadd.f32 %v160_v48, %v150_v45  ;;  %v165_v50 = vadd.f32 %v160_v48, %v151_v46 }
 0x15b   :  { %v171_v51 = vcombine.low %v164_v49, %v165_v50 }
 0x15d   :  { %175 = vst [vmem:[#allocation5 + $0x8] sm:$0xff] %v171_v51 }
 0x15e   :  { %245 = shalt.err (!%p242_p12)
}
 0x15f   :  { %s246_s4 = scalar_lea.hbm %s357_s2, 256 }
 0x160   :  { %p247_p13 = scmp.ne.s32.totalorder %s357_s2, %s246_s4  ;;  %p250_p0 = scmp.lt.u32.totalorder %s246_s4, %s357_s2 }
 0x162   :  { %p252_p1 = pnand %p250_p0, %p247_p13 }
 0x164   :  { %255 = shalt.err (!%p252_p1)
}
 0x165   :  { %187 = dma.vmem_to_hbm [thread:$0]  %s182_s28, 256, %s357_s2, [#allocation4], %s261_s19, %s261_s19, %s262_s20  }
 0x166   :  { %258 = dma.done.wait [#allocation4], 256  }
 0x167   :  { %259 = vsyncadd [#allocation4], 4294967040 }
 0x168   :  { %191 = vsyncpa [#allocation3], 1 }
 0x169   :  { %192 = vsyncpa [#allocation4], 1 }

</bundles_post_ra>
